<compile_context>
chip_gen: v7x
topology: tpu7x:2x2x1
jax: 0.10.0
libtpu: 0.0.40
codegen_flags: <defaults>
</compile_context>

<pallas_src>
import jax
import jax.numpy as jnp
from jax.experimental import pallas as pl
from jax.experimental.pallas import tpu as pltpu


def _downsample_kernel(x_ref, a_ref, wk_ref, o_ref):
    # x_ref:  (1, Cin, THo, 2W)      rows (2h, 2h+1) concatenated on the lanes
    # a_ref:  (W, Wo)                horizontal 2->1 pooling matrix (0 / 0.25)
    # wk_ref: (Cout*THo, Cin*THo)    kron(conv_weight, I_THo)
    # o_ref:  (1, Cout, THo, Wo)     NCHW output block
    cin = x_ref.shape[1]
    tho = x_ref.shape[2]
    two_w = x_ref.shape[3]
    w_in = two_w // 2
    wo = a_ref.shape[1]
    cout = o_ref.shape[1]

    # Leading-dim collapse (minor dim unchanged) -> free view of the block.
    xv = x_ref[...].reshape(cin * tho, two_w).astype(jnp.float32)

    # Stage 1: ONE vertical pair-sum add + ONE horizontal-pool matmul.
    vsum = xv[:, :w_in] + xv[:, w_in:]                        # (Cin*THo, W)
    pooled = jnp.dot(vsum, a_ref[...],
                     preferred_element_type=jnp.float32)      # (Cin*THo, Wo)

    # Stage 2: ONE channel-mixing matmul (1x1 conv as kron(w, I_THo) @ pooled).
    out = jnp.dot(wk_ref[...], pooled,
                  preferred_element_type=jnp.float32)         # (Cout*THo, Wo)

    # Leading-dim expand (minor dim unchanged) -> free; one full-block store.
    o_ref[...] = out.reshape(1, cout, tho, wo).astype(o_ref.dtype)


def _vmem_capacity_bytes():
    """Physical per-core VMEM; falls back to the smallest (v7x, 64 MiB)."""
    try:
        return int(pltpu.get_tpu_info().vmem_capacity_bytes)
    except Exception:
        return 64 * 1024 * 1024


def _pick_tile_rows(Ho, W, Wo, Cin, Cout, itemsize, resident_budget_bytes,
                    sublane=8, min_row_blocks=1, max_cout_rows=512):
    """Pick THo (output rows per grid step).

    Legal THo: multiples of `sublane` dividing Ho, or Ho itself (block dims
    equal to the full array dims are always BlockSpec-legal).  Among those we
    take the largest that (a) keeps 2x double-buffered blocks + resident
    constants under the per-generation VMEM budget, (b) keeps the kron
    redundancy (Cout*THo rows) small enough that the MXU work stays under the
    HBM roofline, and (c) if possible yields >= min_row_blocks grid steps
    (feed both v7x TensorCores when N == 1).
    """
    legal = [t for t in range(sublane, Ho + 1, sublane) if Ho % t == 0]
    if Ho not in legal:
        legal.append(Ho)  # whole-plane fallback; budget is still checked below.

    def fits(t):
        x_blk = Cin * t * 2 * W * itemsize
        o_blk = Cout * t * Wo * itemsize
        w_krn = Cin * Cout * t * t * 4
        a_mat = W * Wo * 4
        return 2 * (x_blk + o_blk) + w_krn + a_mat <= resident_budget_bytes

    def compute_ok(t):
        return Cout * t <= max_cout_rows

    good = [t for t in legal if fits(t) and compute_ok(t)]
    preferred = [t for t in good if Ho // t >= min_row_blocks]
    if preferred:
        return max(preferred)
    if good:
        return max(good)
    # Nothing fits comfortably: take the smallest legal tile (never the
    # unchecked whole plane).  TODO(synk): ragged/masked last tile for awkward
    # Ho that is not a multiple of 8.
    return min(legal)


@jax.jit
def downsample(x_nchw, conv_weight):
    """Forward pass of DownSample (bilinear 0.5x + 1x1 conv, bias=False).

    x_nchw:      (N, Cin, H, W), H and W even.
    conv_weight: (Cout, Cin, 1, 1)  (PyTorch Conv2d layout).
    returns:     (N, Cout, H//2, W//2), dtype of x.
    """
    N, Cin, H, W = x_nchw.shape
    Cout = conv_weight.shape[0]
    assert H % 2 == 0 and W % 2 == 0, (
        "DownSample kernel assumes even H and W (exact 2x bilinear downscale).")
    # TODO(synk): odd H/W (PyTorch floors the output size and uses non-uniform
    # border weights for bilinear) is not implemented.
    Ho, Wo = H // 2, W // 2

    itemsize = jnp.dtype(x_nchw.dtype).itemsize
    cap = _vmem_capacity_bytes()
    # v5e/v6e (128 MiB VMEM): 40 MiB resident / 96 MiB scoped limit.
    # v7x     (64 MiB VMEM):  24 MiB resident / 48 MiB scoped limit.
    resident_budget = min(40 * 1024 * 1024, int(cap * 0.375))
    vmem_limit = min(96 * 1024 * 1024, int(cap * 0.75))

    THo = _pick_tile_rows(
        Ho, W, Wo, Cin, Cout, itemsize, resident_budget,
        sublane=8 if itemsize == 4 else 16,
        min_row_blocks=2 if N == 1 else 1)
    n_row_blocks = Ho // THo

    # Free (bitcast) reshape: rows 2h and 2h+1 land side by side on the lanes.
    x2 = x_nchw.reshape(N, Cin, Ho, 2 * W)

    # Constant horizontal 2->1 pooling matrix with the 0.25 bilinear weight
    # folded in (0.25 is exact in every float dtype; conv weight stays as-is).
    a_pool = (0.25 * (jnp.arange(W)[:, None] // 2
                      == jnp.arange(Wo)[None, :])).astype(jnp.float32)   # (W, Wo)
    # 1x1 conv expressed over the (Cin*THo, Wo) pooled layout:
    #   kron(w, I_THo)[co*THo + r, ci*THo + r'] = w[co, ci] * (r == r').
    w2d = conv_weight[:, :, 0, 0].astype(jnp.float32)                    # (Cout, Cin)
    w_kron = jnp.kron(w2d, jnp.eye(THo, dtype=jnp.float32))   # (Cout*THo, Cin*THo)

    flops = (N * Cin * Ho * W                              # vertical pair sums
             + 2 * N * Cin * Ho * W * Wo                   # horizontal-pool matmul
             + 2 * N * Cout * Ho * Cin * THo * Wo)         # kron 1x1-conv matmul
    bytes_accessed = (N * Cin * H * W * itemsize
                      + N * Cout * Ho * Wo * itemsize
                      + W * Wo * 4
                      + Cout * THo * Cin * THo * 4)

    out = pl.pallas_call(
        _downsample_kernel,
        out_shape=jax.ShapeDtypeStruct((N, Cout, Ho, Wo), x_nchw.dtype),
        grid_spec=pltpu.PrefetchScalarGridSpec(
            num_scalar_prefetch=0,
            grid=(N, n_row_blocks),
            in_specs=[
                pl.BlockSpec((1, Cin, THo, 2 * W), lambda n, r: (n, 0, r, 0)),
                pl.BlockSpec((W, Wo), lambda n, r: (0, 0)),
                pl.BlockSpec((Cout * THo, Cin * THo), lambda n, r: (0, 0)),
            ],
            out_specs=pl.BlockSpec((1, Cout, THo, Wo), lambda n, r: (n, 0, r, 0)),
        ),
        compiler_params=pltpu.CompilerParams(
            dimension_semantics=("parallel", "parallel"),
            vmem_limit_bytes=vmem_limit,
        ),
        cost_estimate=pl.CostEstimate(
            flops=flops, transcendentals=0, bytes_accessed=bytes_accessed),
    )(x2, a_pool, w_kron)
    return out


def _reference(x_nchw, conv_weight):
    # Pure-JAX reference: 2x2 average pool then 1x1 conv (no bias).
    N, Cin, H, W = x_nchw.shape
    Ho, Wo = H // 2, W // 2
    pooled = x_nchw.reshape(N, Cin, Ho, 2, Wo, 2).mean(axis=(3, 5))
    w2d = conv_weight[:, :, 0, 0]                                        # (Cout, Cin)
    return jnp.einsum("oc,nchw->nohw", w2d, pooled)


if __name__ == "__main__":
    in_channels, s_factor = 4, 4
    N, H, W = 2, 16, 16
    out_channels = in_channels + s_factor

    key = jax.random.PRNGKey(0)
    kx, kw = jax.random.split(key)
    x = jax.random.normal(kx, (N, in_channels, H, W), dtype=jnp.float32)

    # Deterministic Conv2d weight init (kaiming-uniform-style bound), bias=False.
    fan_in = in_channels * 1 * 1
    bound = 1.0 / (fan_in ** 0.5)
    w = jax.random.uniform(
        kw, (out_channels, in_channels, 1, 1), dtype=jnp.float32,
        minval=-bound, maxval=bound,
    )

    y = jax.block_until_ready(downsample(x, w))
    y_ref = _reference(x, w)

    assert y.shape == (N, out_channels, H // 2, W // 2), y.shape
    assert jnp.allclose(y, y_ref, atol=1e-5, rtol=1e-5), (
        float(jnp.max(jnp.abs(y - y_ref))))
    print("KERNEL_OK")
</pallas_src>

<mosaic_0001>
module attributes {stable_mosaic.version = 11 : i64} {
  func.func @_downsample_kernel(%arg0: i32, %arg1: i32, %arg2: memref<1x4x8x32xf32, #tpu.memory_space<vmem>>, %arg3: memref<16x8xf32, #tpu.memory_space<vmem>>, %arg4: memref<64x32xf32, #tpu.memory_space<vmem>>, %arg5: memref<1x8x8x8xf32, #tpu.memory_space<vmem>>) attributes {dimension_semantics = [#tpu.dimension_semantics<parallel>, #tpu.dimension_semantics<parallel>], iteration_bounds = array<i64: 2, 1>, scalar_prefetch = 0 : i64, scratch_operands = 0 : i64, tpu.core_type = #tpu.core_type<tc>, window_params = [{transform_indices = @transform_0, window_bounds = array<i64: 1, 4, 8, 32>}, {pipeline_mode = #tpu.pipeline_mode<synchronous>, transform_indices = @transform_1, window_bounds = array<i64: 16, 8>}, {pipeline_mode = #tpu.pipeline_mode<synchronous>, transform_indices = @transform_2, window_bounds = array<i64: 64, 32>}, {transform_indices = @transform_3, window_bounds = array<i64: 1, 8, 8, 8>}]} {
    %c0 = arith.constant 0 : index
    %c0_0 = arith.constant 0 : index
    %c0_1 = arith.constant 0 : index
    %c0_2 = arith.constant 0 : index
    %0 = vector.load %arg2[%c0, %c0_0, %c0_1, %c0_2] : memref<1x4x8x32xf32, #tpu.memory_space<vmem>>, vector<1x4x8x32xf32>
    %1 = vector.shape_cast %0 : vector<1x4x8x32xf32> to vector<32x32xf32>
    %2 = vector.extract_strided_slice %1 {offsets = [0, 0], sizes = [32, 16], strides = [1, 1]} : vector<32x32xf32> to vector<32x16xf32>
    %3 = vector.extract_strided_slice %1 {offsets = [0, 16], sizes = [32, 16], strides = [1, 1]} : vector<32x32xf32> to vector<32x16xf32>
    %4 = arith.addf %2, %3 : vector<32x16xf32>
    %c0_3 = arith.constant 0 : index
    %c0_4 = arith.constant 0 : index
    %5 = vector.load %arg3[%c0_3, %c0_4] : memref<16x8xf32, #tpu.memory_space<vmem>>, vector<16x8xf32>
    %cst = arith.constant dense<0.000000e+00> : vector<32x8xf32>
    %6 = tpu.matmul %4, %5, %cst {dimension_numbers = #tpu.dot_dimension_numbers<[1], [0], [0], [1], [0, 0, 1, 1], [], []>} : vector<32x16xf32>, vector<16x8xf32>, vector<32x8xf32> -> vector<32x8xf32>
    %c0_5 = arith.constant 0 : index
    %c0_6 = arith.constant 0 : index
    %7 = vector.load %arg4[%c0_5, %c0_6] : memref<64x32xf32, #tpu.memory_space<vmem>>, vector<64x32xf32>
    %cst_7 = arith.constant dense<0.000000e+00> : vector<64x8xf32>
    %8 = tpu.matmul %7, %6, %cst_7 {dimension_numbers = #tpu.dot_dimension_numbers<[1], [0], [0], [1], [0, 0, 1, 1], [], []>} : vector<64x32xf32>, vector<32x8xf32>, vector<64x8xf32> -> vector<64x8xf32>
    %9 = vector.shape_cast %8 : vector<64x8xf32> to vector<1x8x8x8xf32>
    %c0_8 = arith.constant 0 : index
    %c0_9 = arith.constant 0 : index
    %c0_10 = arith.constant 0 : index
    %c0_11 = arith.constant 0 : index
    %10 = vector.load %arg5[%c0_8, %c0_9, %c0_10, %c0_11] : memref<1x8x8x8xf32, #tpu.memory_space<vmem>>, vector<1x8x8x8xf32>
    tpu.vector_store %arg5[%c0_8, %c0_9, %c0_10, %c0_11], %9 {strides = array<i32>} : memref<1x8x8x8xf32, #tpu.memory_space<vmem>>, vector<1x8x8x8xf32>,
    return
  }
  func.func @transform_0(%arg0: i32, %arg1: i32) -> (i32, i32, i32, i32) {
    %c0_i32 = arith.constant 0 : i32
    %c0_i32_0 = arith.constant 0 : i32
    %c0_i32_1 = arith.constant 0 : i32
    return %arg0, %c0_i32, %arg1, %c0_i32_0 : i32, i32, i32, i32
  }
  func.func @transform_1(%arg0: i32, %arg1: i32) -> (i32, i32) {
    %c0_i32 = arith.constant 0 : i32
    %c0_i32_0 = arith.constant 0 : i32
    %c0_i32_1 = arith.constant 0 : i32
    return %c0_i32, %c0_i32_0 : i32, i32
  }
  func.func @transform_2(%arg0: i32, %arg1: i32) -> (i32, i32) {
    %c0_i32 = arith.constant 0 : i32
    %c0_i32_0 = arith.constant 0 : i32
    %c0_i32_1 = arith.constant 0 : i32
    return %c0_i32, %c0_i32_0 : i32, i32
  }
  func.func @transform_3(%arg0: i32, %arg1: i32) -> (i32, i32, i32, i32) {
    %c0_i32 = arith.constant 0 : i32
    %c0_i32_0 = arith.constant 0 : i32
    %c0_i32_1 = arith.constant 0 : i32
    return %arg0, %c0_i32, %arg1, %c0_i32_0 : i32, i32, i32, i32
  }
}

</mosaic_0001>

<bundles_post_ra>
// kernel: downsample.1
= control target key start
LH: loop header
LB: loop body
LE: loop exit
PB: predicated region body
PF: predicated region fallthrough
CT: control target
= control target key end

     0   :  { %8 = vsyncpa [#allocation3], 0  ;;  %s972_s0 = inlined_call_operand.vmem [shape: f32[2,4,8,32], index: 0, kind: input, shape index: {}]   ;;  %s973_s1 = inlined_call_operand.vmem [shape: f32[16,8], index: 1, kind: input, shape index: {}]   ;;  %s974_s2 = inlined_call_operand.vmem [shape: f32[64,32], index: 2, kind: input, shape index: {}]   ;;  %s975_s3 = inlined_call_operand.hbm [shape: f32[2,8,8,8], index: 3, kind: output, shape index: {}]  }
   0x1   :  { %10 = vsyncpa [#allocation3 + $0x1], 0  ;;  %s811_s12 = smov 0   ;;  %s813_s13 = smov 0  }
   0x2   :  { %s815_s14 = smov 0   ;;  %s817_s15 = smov 0  }
   0x3   :  { %s819_s16 = smov 0   ;;  %s821_s17 = smov 0  }
   0x4 LB: > { %s558_s18 = sadd.s32 4294967295, %s785_s17   ;;  %s559_s19 = sadd.s32 4294967294, %s785_s17   ;;  %s785_s17 = sphi %s821_s17, %s16_s17   ;;  %s781_s16 = sphi %s819_s16, %s982_s16   ;;  %s777_s15 = sphi %s817_s15, %s981_s15   ;;  %s773_s14 = sphi %s815_s14, %s980_s14   ;;  %s769_s13 = sphi %s813_s13, %s979_s13   ;;  %s765_s12 = sphi %s811_s12, %s978_s12  }
   0x5   : > { %s28_s20 = sadd.s32 1, %s781_s16  ;;  %s107_s21 = sadd.s32 1, %s773_s14 }
   0x6   : > { %p30_p0 = scmp.ge.s32.totalorder %s28_s20, 2  ;;  %p117_p1 = scmp.ne.s32.totalorder %s773_s14, %s769_s13 }
   0x7   : > { %p118_p2 = scmp.eq.s32.totalorder %s558_s18, 1  ;;  %p123_p3 = scmp.ne.s32.totalorder %s769_s13, %s765_s12 }
   0x8   : > { %s984_s20 = smov (%p30_p0, %s28_s20), 0  ;;  %p124_p5 = scmp.eq.s32.totalorder %s559_s19, 1 }
   0x9   : > { %p851_p4 = por %p118_p2, %p117_p1  ;;  %s102_s23 = ssub.s32 %s781_s16, %s984_s20 }
   0xa   : > { %p562_p6 = scmp.ge.s32.totalorder %s785_s17, 1  ;;  %p105_p7 = scmp.eq.s32.totalorder %s102_s23, 0 }
   0xb   : > { %p858_p8 = por %p124_p5, %p123_p3  ;;  %p159_p9 = scmp.lt.s32.totalorder %s785_s17, 3 }
   0xc   : > { %s864_s25 = scalar_select %p105_p7, %s773_s14, %s107_s21  }
   0xd   : > { %p160_p10 = pnand %p562_p6, %p159_p9 }
   0xe   : > { %p186_p11 = scmp.lt.s32.totalorder (!%p160_p10), %s777_s15, 1  ;;  %v218_v0 = vld [vmem:[%s973_s1] sm:$0xff] (!%p160_p10)  ;;  %v219_v1 = vld [vmem:[%s973_s1 + $0x8] sm:$0xff] (!%p160_p10)  ;;  %s787_s8 = smov (!%p160_p10), 112   ;;  %vm220_vm0 = vcmask (!%p160_p10), 130048   ;;  %v320_v15 = vld [vmem:[%s974_s2 + $0x10] sm:$0xff] (!%p160_p10) }
   0xf   : > { %163 = sbr.rel (%p160_p10) target bundleno = 607 (0x25f), region = 32  ;;  %v633_v2 = vpack.c.bf16 (!%p160_p10), %v219_v1, %v218_v0  ;;  %vm326_vm1 = vcmask (!%p160_p10), 261120   ;;  %v318_v16 = vld [vmem:[%s974_s2] sm:$0xff] (!%p160_p10)  ;;  %v321_v23 = vld [vmem:[%s974_s2 + $0x18] sm:$0xff] (!%p160_p10)  ;;  %v319_v24 = vld [vmem:[%s974_s2 + $0x8] sm:$0xff] (!%p160_p10)  ;;  %vm456_vm2 = vcmask (!%p160_p10), 64512  }
  0x10   : > { %624 = vmatprep.mubr.msk.f32.mxu1 (!%p160_p10), %vm326_vm1, %v320_v15  ;;  %v322_v25 = vld [vmem:[%s974_s2 + $0x20] sm:$0xff] (!%p160_p10)  ;;  %v323_v26 = vld [vmem:[%s974_s2 + $0x28] sm:$0xff] (!%p160_p10)  ;;  %v324_v27 = vld [vmem:[%s974_s2 + $0x30] sm:$0xff] (!%p160_p10)  ;;  %s584_s11 = sshll.u32 (!%p160_p10), %s777_s15, 10  ;;  %s788_s27 = smov (!%p160_p10), [#allocation2]  }
  0x11   : > { %634 = vmatprep.subr.bf16.mxu0 (!%p160_p10), %v633_v2  ;;  %v325_v28 = vld [vmem:[%s974_s2 + $0x38] sm:$0xff] (!%p160_p10)  ;;  %s920_s23 = scalar_lea.hbm (!%p160_p10), %s975_s3, %s584_s11  ;;  %s711_s28 = sshll.u32 (!%p160_p10), %s788_s27, 4  ;;  %s712_s28 = int_to_ptr.vmem [resolvable:$false] %s711_s28 }
  0x12   : > { %636 = vmatpush3.bf16.msra.mxu0 (!%p160_p10), %v633_v2  ;;  %s713_s29 = scalar_lea.vmem (!%p160_p10), %s712_s28, 2048 }
  0x16   : > { %s187_s30 = scalar_select %p186_p11, %s777_s15, 1 }
  0x18   : > { %s583_s4 = sshll.u32 %s187_s30, 5 }
  0x19   : > { %s193_s7 = scalar_lea.vmem %s972_s0, %s583_s4 }
  0x1a   : > { %v194_v3 = vld [vmem:[%s193_s7] sm:$0xff]  ;;  %v196_v4 = vld [vmem:[%s193_s7 + $0x10] sm:$0xff]  ;;  %v195_v5 = vld [vmem:[%s193_s7 + $0x8] sm:$0xff] }
  0x1b   : > { %202 = vrot.lane.b32.xlu0 %v194_v3, %s787_s8  ;;  %206 = vrot.lane.b32.xlu1 %v196_v4, %s787_s8  ;;  %v197_v6 = vld [vmem:[%s193_s7 + $0x18] sm:$0xff] }
  0x1f   : > { %204 = vrot.lane.b32.xlu0 %v195_v5, %s787_s8  ;;  %208 = vrot.lane.b32.xlu1 %v197_v6, %s787_s8  ;;  %s183_s8 = sand.u32 1, %s769_s13  }
  0x20   : > { %s563_s9 = sshll.u32 %s183_s8, 6  ;;  %s926_s15 = scalar_lea.sflag [#allocation3], %s183_s8 }
  0x21   : > { %s185_s10 = scalar_lea.vmem [#allocation2], %s563_s9 }
  0x22   : > { %s480_s18 = sshll.u32 %s185_s10, 4  ;;  %s922_s18 = int_to_ptr.vmem [resolvable:$true] %s480_s18 }
  0x23   : > { %s707_s26 = scalar_lea.vmem %s922_s18, 1024  ;;  %p714_p1 = scmp.lt.s32.totalorder %s922_s18, %s712_s28 }
  0x24   : > { %p708_p12 = scmp.ne.s32.totalorder %s922_s18, %s707_s26  ;;  %p715_p2 = scmp.lt.s32.totalorder %s713_s29, %s707_s26 }
  0x26   : > { %p709_p13 = pnand %p708_p12, %p851_p4  ;;  %p716_p3 = por %p715_p2, %p714_p1 }
  0x28   : > { %p710_p0 = pneg %p709_p13 }
  0x2a   : > { %p717_p5 = pnand %p716_p3, %p710_p0 }
  0x8d   : > { %v203_v7 = vpop.permute.xlu0 %202  ;;  %v207_v8 = vpop.permute.xlu1 %206 }
  0x8e   : > { %v214_v9 = vadd.f32 %v203_v7, %v194_v3  ;;  %v216_v10 = vadd.f32 %v207_v8, %v196_v4 }
  0x90   : > { %607 = vmatprep.mubr.msk.f32.mxu0 %vm220_vm0, %v214_v9 }
  0x91   : > { %v205_v11 = vpop.permute.xlu0 %204  ;;  %v209_v12 = vpop.permute.xlu1 %208 }
  0x92   : > { %v215_v13 = vadd.f32 %v205_v11, %v195_v5  ;;  %v217_v14 = vadd.f32 %v209_v12, %v197_v6 }
  0x94   : > { %608 = vmatmul.mubr.msk.f32.vlgmr.msra.gmra.mrb[0].mxu0 %vm220_vm0, %v215_v13 }
  0x95   : > { %610 = vmatprep.mubr.msk.f32.mxu0 %vm220_vm0, %v216_v10 }
  0x98   : > { %611 = vmatmul.mubr.msk.f32.gmra.mrb[2].mxu0 %vm220_vm0, %v217_v14 }
  0x99   : > { %621 = vmatprep.mubr.msk.f32.mxu0 %vm326_vm1, %v318_v16 }
 0x167   : > { %v609_v17 = vpop.f32.mrb[0].mxu0 }
 0x168   : > { %v299_v18 = vpop.f32.mrb[1].mxu0 }
 0x169   : > { %v637_v19 = vpack.c.bf16 %v609_v17, %v299_v18 }
 0x16b   : > { %v612_v20 = vpop.f32.mrb[2].mxu0  ;;  %638 = vmatprep.subr.bf16.mxu0 %v637_v19  ;;  %645 = vmatprep.subr.bf16.mxu1 %v637_v19 }
 0x16c   : > { %v309_v21 = vpop.f32.mrb[3].mxu0  ;;  %640 = vmatpush3.bf16.msra.mxu0 %v637_v19  ;;  %647 = vmatpush3.bf16.msra.mxu1 %v637_v19 }
 0x16d   : > { %v641_v22 = vpack.c.bf16 %v612_v20, %v309_v21 }
 0x16f   : > { %642 = vmatprep.subr.bf16.mxu0 %v641_v22  ;;  %646 = vmatprep.subr.bf16.mxu1 %v641_v22 }
 0x170   : > { %644 = vmatpush3.bf16.msra.mxu0 %v641_v22  ;;  %648 = vmatpush3.bf16.msra.mxu1 %v641_v22 }
 0x173   : > { %625 = vmatmul.mubr.msk.f32.vlgmr.msra.gmra.mrb[0].mxu1 %vm326_vm1, %v321_v23  ;;  %622 = vmatmul.mubr.msk.f32.vlgmr.msra.gmra.mrb[4].mxu0 %vm326_vm1, %v319_v24 }
 0x174   : > { %627 = vmatprep.mubr.msk.f32.mxu1 %vm326_vm1, %v322_v25 }
 0x177   : > { %628 = vmatmul.mubr.msk.f32.gmra.mrb[2].mxu1 %vm326_vm1, %v323_v26 }
 0x178   : > { %630 = vmatprep.mubr.msk.f32.mxu1 %vm326_vm1, %v324_v27 }
 0x17b   : > { %631 = vmatmul.mubr.msk.f32.gmra.mrb[4].mxu1 %vm326_vm1, %v325_v28 }
 0x246   : > { %v626_v29 = vpop.f32.mrb[0].mxu1  ;;  %v623_v30 = vpop.f32.mrb[4].mxu0 }
 0x247   : > { %460 = vst.msk [vmem:[%s185_s10 + $0x18] sm:$0xff] %vm456_vm2, %v626_v29  ;;  %v427_v31 = vpop.f32.mrb[1].mxu1  ;;  %458 = vst.msk [vmem:[%s185_s10 + $0x8] sm:$0xff] %vm456_vm2, %v623_v30  ;;  %v417_v32 = vpop.f32.mrb[5].mxu0 }
 0x248   : > { %459 = vst.msk [vmem:[%s185_s10 + $0x10] sm:$0xff] %vm456_vm2, %v427_v31  ;;  %457 = vst.msk [vmem:[%s185_s10] sm:$0xff] %vm456_vm2, %v417_v32 }
 0x24a   : > { %v629_v33 = vpop.f32.mrb[2].mxu1 }
 0x24b   : > { %462 = vst.msk [vmem:[%s185_s10 + $0x28] sm:$0xff] %vm456_vm2, %v629_v33  ;;  %v437_v34 = vpop.f32.mrb[3].mxu1 }
 0x24c   : > { %461 = vst.msk [vmem:[%s185_s10 + $0x20] sm:$0xff] %vm456_vm2, %v437_v34 }
 0x24e   : > { %v632_v35 = vpop.f32.mrb[4].mxu1 }
 0x24f   : > { %464 = vst.msk [vmem:[%s185_s10 + $0x38] sm:$0xff] %vm456_vm2, %v632_v35  ;;  %v447_v36 = vpop.f32.mrb[5].mxu1 }
 0x250   : > { %463 = vst.msk [vmem:[%s185_s10 + $0x30] sm:$0xff] %vm456_vm2, %v447_v36 }
 0x251   : > { %720 = shalt.err (!%p717_p5)
}
 0x252   : > { %s721_s30 = scalar_lea.hbm %s920_s23, 1024  ;;  %s725_s6 = scalar_lea.hbm %s975_s3, 2048 }
 0x253   : > { %p722_p6 = scmp.ne.s32.totalorder %s920_s23, %s721_s30  ;;  %p726_p10 = scmp.lt.u32.totalorder %s920_s23, %s975_s3 }
 0x254   : > { %p727_p11 = scmp.lt.u32.totalorder %s725_s6, %s721_s30  ;;  %p729_p13 = scmp.lt.u32.totalorder %s721_s30, %s920_s23 }
 0x255   : > { %p723_p7 = pnand %p722_p6, %p851_p4 }
 0x256   : > { %p728_p12 = por %p727_p11, %p726_p10 }
 0x257   : > { %p724_p9 = pneg %p723_p7 }
 0x258   : > { %p730_p0 = por %p729_p13, %p728_p12 }
 0x25a   : > { %p731_p1 = pnand %p730_p0, %p724_p9 }
 0x25c   : > { %734 = shalt.err (!%p731_p1)
}
 0x25d   : > { %s789_s9 = smov 128   ;;  %s790_s10 = smov 8  }
 0x25e   : > { %649 = dma.vmem_to_hbm [thread:$0]  (%p851_p4), %s922_s18, 1024, %s920_s23, %s926_s15, %s789_s9, %s789_s9, %s790_s10  }
 0x25f PF: > { %p655_p2 = scmp.ge.s32.totalorder %s785_s17, 2  ;;  %s495_s11 = sand.u32 1, %s765_s12  }
 0x260   : > { %s496_s19 = scalar_lea.sflag [#allocation3], %s495_s11 }
 0x261   : > { %p652_p3 = pnand %p655_p2, %p858_p8 }
 0x263   : > { %760 = dma.done.wait (!%p652_p3), %s496_s19, 1024  }
 0x264   : > { %762 = vsyncadd (!%p652_p3), %s496_s19, 4294966272  ;;  %s16_s17 = sadd.s32 1, %s785_s17   ;;  %s978_s12 = smov %s769_s13 }
 0x265   : > { %p13_p5 = scmp.ge.s32.totalorder %s16_s17, 4   ;;  %s979_s13 = smov %s773_s14 }
 0x266   : > { %s980_s14 = smov %s864_s25  ;;  %s981_s15 = smov %s781_s16 }
 0x267   : > { %s982_s16 = smov %s984_s20  ;;  %15 = sbr.rel (!%p13_p5) target bundleno = 4 (0x4), region = 67 }
 0x26e   :  { %501 = vsyncpa [#allocation3], 1 }
 0x26f   :  { %503 = vsyncpa [#allocation3 + $0x1], 1 }

</bundles_post_ra>
